<compile_context>
chip_gen: v7x
topology: tpu7x:2x2x1
jax: 0.10.0
libtpu: 0.0.40
codegen_flags: <defaults>
</compile_context>

<pallas_src>
import jax
import jax.numpy as jnp
from jax.experimental import pallas as pl
from jax.experimental.pallas import tpu as pltpu


# Concrete equation implemented by the kernel (mirrors the eval'd string).
EQ_STRING = "p[0]*torch.exp(-p[1]*x) + p[2]*torch.tanh(p[3]*x)"
COEFFS = [0.5, 1.5, 2.0, 0.25]   # deterministic "trained" parameters

LANE = 128
TILE_R = 2048  # (2048, 128) f32 block = 1 MiB; 2 in-bufs + 2 out-bufs ~ 4 MiB VMEM


def _eq_kernel(p_ref, x_ref, o_ref):
    """Elementwise: p0*exp(-p1*x) + p2*tanh(p3*x).

    p_ref: SMEM f32[4]          (scalar coefficients)
    x_ref: VMEM [tile_r, 128]   (native input dtype)
    o_ref: VMEM [tile_r, 128]   (native output dtype)
    """
    # Read the four SMEM scalars once; hoist the negate out of the vector expr.
    p0 = p_ref[0]
    neg_p1 = -p_ref[1]
    p2 = p_ref[2]
    p3 = p_ref[3]

    x = x_ref[...].astype(jnp.float32)          # cast in-register (free-ish)
    # exp / tanh run on the EUP; the muls/adds on the VPU.
    y = p0 * jnp.exp(neg_p1 * x) + p2 * jnp.tanh(p3 * x)
    o_ref[...] = y.astype(o_ref.dtype)


def module_eq_forward(x: jax.Array, coeffs: jax.Array) -> jax.Array:
    """Pallas implementation of _ModuleEq.forward for EQ_STRING."""
    orig_shape = x.shape
    orig_dtype = x.dtype
    total = x.size

    # Lane-dense 2-D slab: last dim -> 128 lanes, rows -> sublane/grid axis.
    rows = -(-total // LANE)
    pad = rows * LANE - total
    x_flat = x.reshape(-1)
    if pad:
        x_flat = jnp.pad(x_flat, (0, pad))
    x2 = x_flat.reshape(rows, LANE)

    # Tile: full rows if small, otherwise 2048-row (1 MiB f32) blocks.
    # (TILE_R is a multiple of 8, and a full-extent block is always legal.)
    tile_r = TILE_R if rows >= TILE_R else rows
    grid = (pl.cdiv(rows, tile_r),)

    bytes_accessed = rows * LANE * (x2.dtype.itemsize
                                    + jnp.dtype(orig_dtype).itemsize)
    cost = pl.CostEstimate(flops=4 * total,
                           transcendentals=2 * total,
                           bytes_accessed=bytes_accessed)

    out2 = pl.pallas_call(
        _eq_kernel,
        out_shape=jax.ShapeDtypeStruct((rows, LANE), orig_dtype),
        grid=grid,
        in_specs=[
            pl.BlockSpec(memory_space=pltpu.MemorySpace.SMEM),   # coeffs
            pl.BlockSpec((tile_r, LANE), lambda i: (i, 0)),      # x tile
        ],
        out_specs=pl.BlockSpec((tile_r, LANE), lambda i: (i, 0)),
        compiler_params=pltpu.CompilerParams(
            dimension_semantics=("parallel",)),
        cost_estimate=cost,
    )(coeffs.astype(jnp.float32), x2)

    if pad:
        out_flat = out2.reshape(-1)[:total]
        return out_flat.reshape(orig_shape)
    return out2.reshape(orig_shape)


def module_eq_reference(x: jax.Array, coeffs: jax.Array) -> jax.Array:
    """Pure-JAX reference of the same equation (what eval() would compute)."""
    p = coeffs.astype(jnp.float32)
    xf = x.astype(jnp.float32)
    y = p[0] * jnp.exp(-p[1] * xf) + p[2] * jnp.tanh(p[3] * xf)
    return y.astype(x.dtype)


if __name__ == "__main__":
    key = jax.random.PRNGKey(0)
    # Small NCHW input consistent with a conv-style pipeline feeding this module.
    x = jax.random.normal(key, (2, 4, 16, 16), dtype=jnp.float32)
    coeffs = jnp.asarray(COEFFS, dtype=jnp.float32)

    y = module_eq_forward(x, coeffs)
    y = jax.block_until_ready(y)

    y_ref = module_eq_reference(x, coeffs)
    assert y.shape == x.shape and y.dtype == x.dtype
    assert jnp.allclose(y, y_ref, atol=1e-5, rtol=1e-5), "mismatch vs reference"

    print("KERNEL_OK")
</pallas_src>

<mosaic_0001>
module attributes {stable_mosaic.version = 11 : i64} {
  func.func @_eq_kernel(%arg0: i32, %arg1: memref<4xf32, #tpu.memory_space<smem>>, %arg2: memref<16x128xf32, #tpu.memory_space<vmem>>, %arg3: memref<16x128xf32, #tpu.memory_space<vmem>>) attributes {dimension_semantics = [#tpu.dimension_semantics<parallel>], iteration_bounds = array<i64: 1>, scalar_prefetch = 0 : i64, scratch_operands = 0 : i64, tpu.core_type = #tpu.core_type<tc>, window_params = [{transform_indices = @transform_0, window_bounds = array<i64: 4>}, {transform_indices = @transform_1, window_bounds = array<i64: 16, 128>}, {transform_indices = @transform_2, window_bounds = array<i64: 16, 128>}]} {
    %c0 = arith.constant 0 : index
    %0 = memref.load %arg1[%c0] : memref<4xf32, #tpu.memory_space<smem>>
    %c1 = arith.constant 1 : index
    %1 = memref.load %arg1[%c1] : memref<4xf32, #tpu.memory_space<smem>>
    %cst = arith.constant 0.000000e+00 : f32
    %2 = arith.subf %cst, %1 : f32
    %c2 = arith.constant 2 : index
    %3 = memref.load %arg1[%c2] : memref<4xf32, #tpu.memory_space<smem>>
    %c3 = arith.constant 3 : index
    %4 = memref.load %arg1[%c3] : memref<4xf32, #tpu.memory_space<smem>>
    %c0_0 = arith.constant 0 : index
    %c0_1 = arith.constant 0 : index
    %5 = vector.load %arg2[%c0_0, %c0_1] : memref<16x128xf32, #tpu.memory_space<vmem>>, vector<16x128xf32>
    %6 = vector.broadcast %2 : f32 to vector<16x128xf32>
    %7 = arith.mulf %6, %5 : vector<16x128xf32>
    %8 = math.exp %7 : vector<16x128xf32>
    %9 = vector.broadcast %0 : f32 to vector<16x128xf32>
    %10 = arith.mulf %9, %8 : vector<16x128xf32>
    %11 = vector.broadcast %4 : f32 to vector<16x128xf32>
    %12 = arith.mulf %11, %5 : vector<16x128xf32>
    %13 = math.tanh %12 : vector<16x128xf32>
    %14 = vector.broadcast %3 : f32 to vector<16x128xf32>
    %15 = arith.mulf %14, %13 : vector<16x128xf32>
    %16 = arith.addf %10, %15 : vector<16x128xf32>
    %c0_2 = arith.constant 0 : index
    %c0_3 = arith.constant 0 : index
    %17 = vector.load %arg3[%c0_2, %c0_3] : memref<16x128xf32, #tpu.memory_space<vmem>>, vector<16x128xf32>
    tpu.vector_store %arg3[%c0_2, %c0_3], %16 {strides = array<i32>} : memref<16x128xf32, #tpu.memory_space<vmem>>, vector<16x128xf32>,
    return
  }
  func.func @transform_0(%arg0: i32) -> i32 {
    %c0_i32 = arith.constant 0 : i32
    %c0_i32_0 = arith.constant 0 : i32
    return %c0_i32 : i32
  }
  func.func @transform_1(%arg0: i32) -> (i32, i32) {
    %c0_i32 = arith.constant 0 : i32
    %c0_i32_0 = arith.constant 0 : i32
    return %arg0, %c0_i32 : i32, i32
  }
  func.func @transform_2(%arg0: i32) -> (i32, i32) {
    %c0_i32 = arith.constant 0 : i32
    %c0_i32_0 = arith.constant 0 : i32
    return %arg0, %c0_i32 : i32, i32
  }
}

</mosaic_0001>

<bundles_post_ra>
// kernel: tpu_custom_call.1
= control target key start
LH: loop header
LB: loop body
LE: loop exit
PB: predicated region body
PF: predicated region fallthrough
CT: control target
= control target key end

     0   :  { %7 = vsyncpa [#allocation5], 0  ;;  %s222_s0 = inlined_call_operand.hbm [shape: f32[4], index: 0, kind: input, shape index: {}]   ;;  %s223_s1 = inlined_call_operand.hbm [shape: f32[16,128], index: 1, kind: input, shape index: {}]   ;;  %s224_s2 = inlined_call_operand.hbm [shape: f32[16,128], index: 2, kind: output, shape index: {}]  }
   0x1   :  { %8 = vsyncpa [#allocation3], 0 }
   0x2   :  { %9 = vsyncpa [#allocation4], 0  ;;  %s100_s11 = scalar_lea.hbm %s222_s0, 16 }
   0x3   :  { %p101_p0 = scmp.ne.s32.totalorder %s222_s0, %s100_s11  ;;  %p104_p1 = scmp.lt.u32.totalorder %s100_s11, %s222_s0 }
   0x5   :  { %p106_p2 = pnand %p104_p1, %p101_p0 }
   0x7   :  { %109 = shalt.err (!%p106_p2)
}
   0x8   :  { %s160_s16 = smov [#allocation2]   ;;  %s161_s19 = smov [#allocation6]  }
   0x9   :  { %17 = dma.hbm_to_smem %s222_s0, 16, %s160_s16, [#allocation5]  }
   0xa   :  { %s23_s20 = sshll.u32 %s161_s19, 4  ;;  %s110_s23 = scalar_lea.hbm %s223_s1, 256  ;;  %s24_s20 = int_to_ptr.vmem [resolvable:$true] %s23_s20 }
   0xb   :  { %p111_p3 = scmp.ne.s32.totalorder %s223_s1, %s110_s23  ;;  %p114_p4 = scmp.lt.u32.totalorder %s110_s23, %s223_s1 }
   0xd   :  { %p116_p5 = pnand %p114_p4, %p111_p3 }
   0xf   :  { %119 = shalt.err (!%p116_p5)
}
  0x10   :  { %s120_s28 = scalar_lea.vmem %s24_s20, 256  ;;  %p125_p7 = scmp.lt.s32.totalorder %s24_s20, %s24_s20 }
  0x11   :  { %p121_p6 = scmp.ne.s32.totalorder %s24_s20, %s120_s28  ;;  %p126_p8 = scmp.lt.s32.totalorder %s120_s28, %s120_s28 }
  0x13   :  { %p127_p9 = por %p126_p8, %p125_p7 }
  0x15   :  { %p128_p10 = pnand %p127_p9, %p121_p6 }
  0x17   :  { %131 = shalt.err (!%p128_p10)
}
  0x18   :  { %s162_s0 = smov 128   ;;  %s163_s29 = smov 8  }
  0x19   :  { %29 = dma.hbm_to_vmem [thread:$0]  %s223_s1, 256, %s24_s20, [#allocation3], %s162_s0, %s162_s0, %s163_s29  }
  0x1a   :  { %154 = dma.done.wait [#allocation5], 16  }
  0x1b   :  { %155 = vsyncadd [#allocation5], 4294967280 }
  0x1c   :  { %156 = dma.done.wait [#allocation3], 256  }
  0x1d   :  { %157 = vsyncadd [#allocation3], 4294967040 }
  0x1e   :  { %36 = sfence }
  0x1f   :  { %s84_s4 = sld [smem:[#allocation2 + $0x1]]  ;;  %s86_s5 = sld [smem:[#allocation2 + $0x3]]  ;;  %v42_v0 = vld [vmem:[#allocation6] sm:$0xff]  ;;  %v43_v1 = vld [vmem:[#allocation6 + $0x8] sm:$0xff] }
  0x20   :  { %s85_s7 = sld [smem:[#allocation2 + $0x2]]  ;;  %s37_s1 = sld [smem:[#allocation2]] }
  0x21   :  { %s164_s8 = smov [#allocation7]  }
  0x22   :  { %s71_s9 = sshll.u32 %s164_s8, 4  ;;  %s72_s9 = int_to_ptr.vmem [resolvable:$true] %s71_s9 }
  0x23   :  { %s132_s10 = scalar_lea.vmem %s72_s9, 256  ;;  %p137_p12 = scmp.lt.s32.totalorder %s72_s9, %s72_s9 }
  0x24   :  { %p133_p11 = scmp.ne.s32.totalorder %s72_s9, %s132_s10  ;;  %p138_p13 = scmp.lt.s32.totalorder %s132_s10, %s132_s10 }
  0x25   :  { %s39_s6 = ssub.f32 0.0, %s84_s4  ;;  %v54_v2 = vstv %s86_s5 }
  0x26   :  { %v55_v4 = vmul.f32 %v54_v2, %v42_v0  ;;  %v56_v5 = vmul.f32 %v54_v2, %v43_v1  ;;  %v59_v10 = vstv %s85_s7  ;;  %v51_v13 = vstv %s37_s1  ;;  %p139_p0 = por %p138_p13, %p137_p12 }
  0x27   :  { %v44_v3 = vstv %s39_s6 }
  0x28   :  { %v45_v6 = vmul.f32 %v44_v3, %v42_v0  ;;  %v46_v7 = vmul.f32 %v44_v3, %v43_v1  ;;  %92 = vtanh.f32 %v55_v4  ;;  %p140_p1 = pnand %p139_p0, %p133_p11 }
  0x29   :  { %94 = vtanh.f32 %v56_v5 }
  0x2a   :  { %v47_v8 = vmul.f32 1.442695, %v45_v6  ;;  %v49_v9 = vmul.f32 1.442695, %v46_v7 }
  0x2c   :  { %96 = vpow2.f32 %v47_v8 }
  0x2d   :  { %98 = vpow2.f32 %v49_v9 }
  0x32   :  { %v93_v11 = vpop.eup %92 }
  0x33   :  { %v95_v12 = vpop.eup %94  ;;  %v60_v14 = vmul.f32 %v93_v11, %v59_v10 }
  0x34   :  { %v61_v16 = vmul.f32 %v95_v12, %v59_v10 }
  0x36   :  { %v97_v15 = vpop.eup %96 }
  0x37   :  { %v99_v17 = vpop.eup %98  ;;  %v52_v18 = vmul.f32 %v97_v15, %v51_v13 }
  0x38   :  { %v53_v19 = vmul.f32 %v99_v17, %v51_v13 }
  0x39   :  { %v62_v20 = vadd.f32 %v60_v14, %v52_v18 }
  0x3a   :  { %v63_v21 = vadd.f32 %v61_v16, %v53_v19 }
  0x3b   :  { %64 = vst [vmem:[#allocation7] sm:$0xff] %v62_v20 }
  0x3c   :  { %65 = vst [vmem:[#allocation7 + $0x8] sm:$0xff] %v63_v21 }
  0x3d   :  { %143 = shalt.err (!%p140_p1)
}
  0x3e   :  { %s144_s13 = scalar_lea.hbm %s224_s2, 256 }
  0x3f   :  { %p145_p2 = scmp.ne.s32.totalorder %s224_s2, %s144_s13  ;;  %p148_p3 = scmp.lt.u32.totalorder %s144_s13, %s224_s2 }
  0x41   :  { %p150_p4 = pnand %p148_p3, %p145_p2 }
  0x43   :  { %153 = shalt.err (!%p150_p4)
}
  0x44   :  { %77 = dma.vmem_to_hbm [thread:$0]  %s72_s9, 256, %s224_s2, [#allocation4], %s162_s0, %s162_s0, %s163_s29  }
  0x45   :  { %158 = dma.done.wait [#allocation4], 256  }
  0x46   :  { %159 = vsyncadd [#allocation4], 4294967040 }
  0x47   :  { %81 = vsyncpa [#allocation3], 1 }
  0x48   :  { %82 = vsyncpa [#allocation4], 1 }
  0x49   :  { %83 = vsyncpa [#allocation5], 1 }

</bundles_post_ra>
